<compile_context>
chip_gen: v7x
topology: tpu7x:2x2x1
jax: 0.10.0
libtpu: 0.0.40
codegen_flags: <defaults>
</compile_context>

<pallas_src>
import jax
import jax.numpy as jnp
from jax.experimental import pallas as pl
from jax.experimental.pallas import tpu as pltpu

_SUBLANE = 8  # vreg sublane width (second-to-last dim granularity)


def _cdiv(a, b):
    return -(-a // b)


def _round_up(n, m):
    return _cdiv(n, m) * m


def _num_tensorcores_per_chip():
    """Heuristic: v7x exposes 2 TensorCores per chip (megacore sharding of
    'parallel' grid axes); v5e/v6e are single-TC."""
    try:
        kind = jax.devices()[0].device_kind.lower()
    except Exception:
        return 1
    return 2 if "v7" in kind else 1


def _choose_batch_tile(batch, block_batch, n_cores):
    """Balanced batch tiles: one big tile on single-TC chips; an even count of
    >=2 tiles on dual-TC chips so both cores get work; never more than one
    sublane's worth of edge padding (handled by Pallas partial blocks)."""
    n_steps = _cdiv(batch, max(block_batch, _SUBLANE))
    if n_cores > 1 and batch >= n_cores * _SUBLANE:
        n_steps = max(n_steps, n_cores)
        n_steps = _cdiv(n_steps, n_cores) * n_cores  # even split across cores
    tb = _round_up(_cdiv(batch, n_steps), _SUBLANE)
    n_steps = _cdiv(batch, tb)
    if n_steps == 1:
        tb = batch  # full-extent block is legal for any batch size
    return tb, n_steps


def _vmem_limit_bytes(tb, in_f, hid, out_f):
    itemsize = 4
    need = itemsize * (
        2 * tb * (in_f + out_f)                        # double-buffered x / out tiles
        + 2 * tb * hid                                 # hidden activations + headroom
        + 2 * (in_f * hid + hid * out_f + hid + out_f) # resident weights + biases
    )
    try:
        cap = int(pltpu.get_tpu_info().vmem_capacity_bytes)
    except Exception:
        cap = 64 * 1024 * 1024                         # conservative (v7x per-TC VMEM)
    cap = int(0.70 * cap)                              # leave compiler headroom
    return int(min(max(4 * need, 16 * 1024 * 1024), cap))


def _qnet_kernel(x_ref, w1_ref, b1_ref, w2_ref, b2_ref, out_ref):
    # Hidden layer on the MXU (f32 accumulate); bias + ReLU on the VPU.
    h = jnp.dot(x_ref[...], w1_ref[...], preferred_element_type=jnp.float32)
    h = jnp.maximum(h + b1_ref[...], 0.0)              # b1 is (1, hid) -> broadcasts
    # Output layer.
    y = jnp.dot(h, w2_ref[...], preferred_element_type=jnp.float32)
    out_ref[...] = (y + b2_ref[...]).astype(out_ref.dtype)


def linear_qnet_forward(x, w1, b1, w2, b2, *, block_batch=1024):
    """Fused forward pass of Linear_QNet.

    x  : [B, in]     float32
    w1 : [in, hid]   float32  (transpose of torch linear1.weight)
    b1 : [hid]
    w2 : [hid, out]  float32  (transpose of torch linear2.weight)
    b2 : [out]
    returns [B, out] float32
    """
    B, in_f = x.shape
    in_w, hid = w1.shape
    hid2, out_f = w2.shape
    assert in_f == in_w and hid == hid2, (x.shape, w1.shape, w2.shape)

    b1 = b1.reshape(1, hid)
    b2 = b2.reshape(1, out_f)

    n_cores = _num_tensorcores_per_chip()
    tb, n_steps = _choose_batch_tile(B, block_batch, n_cores)

    cost = pl.CostEstimate(
        flops=2 * B * (in_f * hid + hid * out_f),
        transcendentals=0,
        bytes_accessed=4 * (B * (in_f + out_f)
                            + in_f * hid + hid + hid * out_f + out_f),
    )

    return pl.pallas_call(
        _qnet_kernel,
        out_shape=jax.ShapeDtypeStruct((B, out_f), x.dtype),
        grid_spec=pltpu.PrefetchScalarGridSpec(
            num_scalar_prefetch=0,
            grid=(n_steps,),
            in_specs=[
                pl.BlockSpec((tb, in_f), lambda i: (i, 0)),    # x: tiled over batch
                pl.BlockSpec((in_f, hid), lambda i: (0, 0)),   # W1: resident
                pl.BlockSpec((1, hid), lambda i: (0, 0)),      # b1: resident
                pl.BlockSpec((hid, out_f), lambda i: (0, 0)),  # W2: resident
                pl.BlockSpec((1, out_f), lambda i: (0, 0)),    # b2: resident
            ],
            out_specs=pl.BlockSpec((tb, out_f), lambda i: (i, 0)),
        ),
        compiler_params=pltpu.CompilerParams(
            dimension_semantics=("parallel",),   # megacore-shard batch tiles (v7x)
            vmem_limit_bytes=_vmem_limit_bytes(tb, in_f, hid, out_f),
        ),
        cost_estimate=cost,
    )(x, w1, b1, w2, b2)


def init_params(key, input_size, hidden_size, output_size, dtype=jnp.float32):
    """PyTorch nn.Linear-style uniform init, stored transposed ([in, out]) at
    logical (unpadded) shapes."""
    k1, k2, k3, k4 = jax.random.split(key, 4)
    bound1 = 1.0 / float(input_size) ** 0.5
    bound2 = 1.0 / float(hidden_size) ** 0.5
    w1 = jax.random.uniform(k1, (input_size, hidden_size), dtype, -bound1, bound1)
    b1 = jax.random.uniform(k2, (hidden_size,), dtype, -bound1, bound1)
    w2 = jax.random.uniform(k3, (hidden_size, output_size), dtype, -bound2, bound2)
    b2 = jax.random.uniform(k4, (output_size,), dtype, -bound2, bound2)
    return w1, b1, w2, b2


# TODO(synk): Linear_QNet.save/load (torch .pth file I/O) and the training step
# (optimizer) have no Pallas-kernel equivalent; only the forward pass is implemented.

if __name__ == "__main__":
    # Snake-game style Q-net shapes.
    input_size, hidden_size, output_size = 11, 32, 3

    key = jax.random.PRNGKey(0)
    kx, kp = jax.random.split(key)
    w1, b1, w2, b2 = init_params(kp, input_size, hidden_size, output_size)

    # batch=8: single full-extent tile.
    # batch=200, block=64: multi-step grid with a partial (masked) last block.
    # batch=13: non-sublane-multiple batch handled as one full-extent block.
    for batch, blk in ((8, 1024), (200, 64), (13, 1024)):
        x = jax.random.normal(
            jax.random.fold_in(kx, batch), (batch, input_size), jnp.float32
        )
        out = linear_qnet_forward(x, w1, b1, w2, b2, block_batch=blk)
        out = jax.block_until_ready(out)

        ref = jnp.maximum(x @ w1 + b1, 0.0) @ w2 + b2
        assert out.shape == (batch, output_size), (out.shape, batch, output_size)
        assert jnp.allclose(out, ref, atol=1e-4, rtol=1e-4), "mismatch vs reference"

    print("KERNEL_OK")
</pallas_src>

<mosaic_0001>
module attributes {stable_mosaic.version = 11 : i64} {
  func.func @_qnet_kernel(%arg0: i32, %arg1: memref<8x11xf32, #tpu.memory_space<vmem>>, %arg2: memref<11x32xf32, #tpu.memory_space<vmem>>, %arg3: memref<1x32xf32, #tpu.memory_space<vmem>>, %arg4: memref<32x3xf32, #tpu.memory_space<vmem>>, %arg5: memref<1x3xf32, #tpu.memory_space<vmem>>, %arg6: memref<8x3xf32, #tpu.memory_space<vmem>>) attributes {dimension_semantics = [#tpu.dimension_semantics<parallel>], iteration_bounds = array<i64: 1>, scalar_prefetch = 0 : i64, scratch_operands = 0 : i64, tpu.core_type = #tpu.core_type<tc>, window_params = [{transform_indices = @transform_0, window_bounds = array<i64: 8, 11>}, {pipeline_mode = #tpu.pipeline_mode<synchronous>, transform_indices = @transform_1, window_bounds = array<i64: 11, 32>}, {pipeline_mode = #tpu.pipeline_mode<synchronous>, transform_indices = @transform_2, window_bounds = array<i64: 1, 32>}, {pipeline_mode = #tpu.pipeline_mode<synchronous>, transform_indices = @transform_3, window_bounds = array<i64: 32, 3>}, {pipeline_mode = #tpu.pipeline_mode<synchronous>, transform_indices = @transform_4, window_bounds = array<i64: 1, 3>}, {transform_indices = @transform_5, window_bounds = array<i64: 8, 3>}]} {
    %c0 = arith.constant 0 : index
    %c0_0 = arith.constant 0 : index
    %0 = vector.load %arg1[%c0, %c0_0] : memref<8x11xf32, #tpu.memory_space<vmem>>, vector<8x11xf32>
    %c0_1 = arith.constant 0 : index
    %c0_2 = arith.constant 0 : index
    %1 = vector.load %arg2[%c0_1, %c0_2] : memref<11x32xf32, #tpu.memory_space<vmem>>, vector<11x32xf32>
    %cst = arith.constant dense<0.000000e+00> : vector<8x32xf32>
    %2 = tpu.matmul %0, %1, %cst {dimension_numbers = #tpu.dot_dimension_numbers<[1], [0], [0], [1], [0, 0, 1, 1], [], []>} : vector<8x11xf32>, vector<11x32xf32>, vector<8x32xf32> -> vector<8x32xf32>
    %c0_3 = arith.constant 0 : index
    %c0_4 = arith.constant 0 : index
    %3 = vector.load %arg3[%c0_3, %c0_4] : memref<1x32xf32, #tpu.memory_space<vmem>>, vector<1x32xf32>
    %4 = vector.broadcast %3 : vector<1x32xf32> to vector<8x32xf32>
    %5 = arith.addf %2, %4 : vector<8x32xf32>
    %cst_5 = arith.constant 0.000000e+00 : f32
    %6 = vector.broadcast %cst_5 : f32 to vector<8x32xf32>
    %7 = arith.maximumf %5, %6 : vector<8x32xf32>
    %c0_6 = arith.constant 0 : index
    %c0_7 = arith.constant 0 : index
    %8 = vector.load %arg4[%c0_6, %c0_7] : memref<32x3xf32, #tpu.memory_space<vmem>>, vector<32x3xf32>
    %cst_8 = arith.constant dense<0.000000e+00> : vector<8x3xf32>
    %9 = tpu.matmul %7, %8, %cst_8 {dimension_numbers = #tpu.dot_dimension_numbers<[1], [0], [0], [1], [0, 0, 1, 1], [], []>} : vector<8x32xf32>, vector<32x3xf32>, vector<8x3xf32> -> vector<8x3xf32>
    %c0_9 = arith.constant 0 : index
    %c0_10 = arith.constant 0 : index
    %10 = vector.load %arg5[%c0_9, %c0_10] : memref<1x3xf32, #tpu.memory_space<vmem>>, vector<1x3xf32>
    %11 = vector.broadcast %10 : vector<1x3xf32> to vector<8x3xf32>
    %12 = arith.addf %9, %11 : vector<8x3xf32>
    %c0_11 = arith.constant 0 : index
    %c0_12 = arith.constant 0 : index
    %13 = vector.load %arg6[%c0_11, %c0_12] : memref<8x3xf32, #tpu.memory_space<vmem>>, vector<8x3xf32>
    tpu.vector_store %arg6[%c0_11, %c0_12], %12 {strides = array<i32>} : memref<8x3xf32, #tpu.memory_space<vmem>>, vector<8x3xf32>,
    return
  }
  func.func @transform_0(%arg0: i32) -> (i32, i32) {
    %c0_i32 = arith.constant 0 : i32
    %c0_i32_0 = arith.constant 0 : i32
    return %arg0, %c0_i32 : i32, i32
  }
  func.func @transform_1(%arg0: i32) -> (i32, i32) {
    %c0_i32 = arith.constant 0 : i32
    %c0_i32_0 = arith.constant 0 : i32
    %c0_i32_1 = arith.constant 0 : i32
    return %c0_i32, %c0_i32_0 : i32, i32
  }
  func.func @transform_2(%arg0: i32) -> (i32, i32) {
    %c0_i32 = arith.constant 0 : i32
    %c0_i32_0 = arith.constant 0 : i32
    %c0_i32_1 = arith.constant 0 : i32
    return %c0_i32, %c0_i32_0 : i32, i32
  }
  func.func @transform_3(%arg0: i32) -> (i32, i32) {
    %c0_i32 = arith.constant 0 : i32
    %c0_i32_0 = arith.constant 0 : i32
    %c0_i32_1 = arith.constant 0 : i32
    return %c0_i32, %c0_i32_0 : i32, i32
  }
  func.func @transform_4(%arg0: i32) -> (i32, i32) {
    %c0_i32 = arith.constant 0 : i32
    %c0_i32_0 = arith.constant 0 : i32
    %c0_i32_1 = arith.constant 0 : i32
    return %c0_i32, %c0_i32_0 : i32, i32
  }
  func.func @transform_5(%arg0: i32) -> (i32, i32) {
    %c0_i32 = arith.constant 0 : i32
    %c0_i32_0 = arith.constant 0 : i32
    return %arg0, %c0_i32 : i32, i32
  }
}

</mosaic_0001>

<bundles_post_ra>
// kernel: tpu_custom_call.1
= control target key start
LH: loop header
LB: loop body
LE: loop exit
PB: predicated region body
PF: predicated region fallthrough
CT: control target
= control target key end

     0   :  { %vm34_vm0 = vcmask 1042432   ;;  %v245_v0 = vmov 0.0|0.0   ;;  %vm246_vm1 = vmmov 1   ;;  %vm247_vm3 = vmmov 0   ;;  %s309_s1 = inlined_call_operand.vmem [shape: f32[11,32], index: 1, kind: input, shape index: {}]   ;;  %s310_s3 = inlined_call_operand.vmem [shape: f32[32,3], index: 3, kind: input, shape index: {}]   ;;  %s311_s0 = inlined_call_operand.vmem [shape: f32[8,11], index: 0, kind: input, shape index: {}]   ;;  %s312_s2 = inlined_call_operand.vmem [shape: f32[1,32], index: 2, kind: input, shape index: {}]   ;;  %s313_s4 = inlined_call_operand.vmem [shape: f32[1,3], index: 4, kind: input, shape index: {}]   ;;  %s314_s5 = inlined_call_operand.vmem [shape: f32[8,3], index: 5, kind: output, shape index: {}]  }
   0x1   :  { %231 = vmatprep.subr.bf16.mxu0 %v245_v0  ;;  %v21_v1 = vld [vmem:[%s309_s1] sm:$0xff]  ;;  %v22_v2 = vld [vmem:[%s309_s1 + $0x8] sm:$0x7]  ;;  %vm233_vm2 = vmpackc.low %vm34_vm0, %vm246_vm1  ;;  %235 = vmatprep.subr.bf16.mxu1 %v245_v0  ;;  %v248_v4 = vmov 0.0   ;;  %vm30_vm4 = vcmask 89088   ;;  %vm120_vm5 = vcmask 261120  }
   0x2   :  { %v232_v3 = vpack.c.bf16 %v22_v2, %v21_v1  ;;  %217 = vmatprep.mubr.msk.f32.mxu0 %vm247_vm3, %v248_v4  ;;  %v109_v5 = vld [vmem:[%s310_s3] sm:$0xff]  ;;  %v110_v6 = vld [vmem:[%s310_s3 + $0x8] sm:$0xff]  ;;  %228 = vmatprep.mubr.msk.f32.mxu1 %vm247_vm3, %v248_v4  ;;  %v111_v9 = vld [vmem:[%s310_s3 + $0x10] sm:$0xff]  ;;  %vm194_vm6 = vcmask 23552  }
   0x3   :  { %v236_v7 = vpack.c.bf16 %v110_v6, %v109_v5  ;;  %v20_v8 = vld [vmem:[%s311_s0] sm:$0xff]  ;;  %v112_v10 = vld [vmem:[%s310_s3 + $0x18] sm:$0xff] }
   0x4   :  { %234 = vmatpush3.bf16.msk.msra.mxu0 %vm233_vm2, %v232_v3  ;;  %v239_v11 = vpack.c.bf16 %v112_v10, %v111_v9  ;;  %v200_v12 = vld [vmem:[%s312_s2] ss:$0 sm:$0xff] }
   0x5   :  { %237 = vmatpush3.bf16.msra.mxu1 %v236_v7  ;;  %v203_v17 = vld [vmem:[%s313_s4] ss:$0 sm:$0xff] }
   0x6   :  { %238 = vmatprep.subr.bf16.mxu1 %v245_v0 }
   0x7   :  { %218 = vmatmul.mubr.msk.f32.vlgmr.msra.gmra.mrb[0].mxu0 %vm30_vm4, %v20_v8 }
   0x9   :  { %240 = vmatpush3.bf16.msra.mxu1 %v239_v11 }
  0xda   :  { %v104_v13 = vpop.f32.mrb[0].mxu0 }
  0xdb   :  { %v105_v14 = vadd.f32 %v200_v12, %v104_v13  ;;  %v219_v15 = vpop.f32.mrb[1].mxu0 }
  0xdd   :  { %v108_v16 = vmax.f32 %v105_v14, 0.0 }
  0xdf   :  { %229 = vmatmul.mubr.msk.f32.vlgmr.msra.gmra.mrb[0].mxu1 %vm120_vm5, %v108_v16 }
 0x1b2   :  { %v190_v18 = vpop.f32.mrb[0].mxu1 }
 0x1b3   :  { %v191_v19 = vadd.f32 %v203_v17, %v190_v18  ;;  %v230_v20 = vpop.f32.mrb[1].mxu1 }
 0x1b5   :  { %195 = vst.msk [vmem:[%s314_s5] sm:$0xff] %vm194_vm6, %v191_v19 }

</bundles_post_ra>
